<compile_context>
chip_gen: v7x
topology: tpu7x:2x2x1
jax: 0.10.0
libtpu: 0.0.40
codegen_flags: <defaults>
</compile_context>

<pallas_src>
from functools import partial

import jax
import jax.numpy as jnp
from jax.experimental import pallas as pl
from jax.experimental.pallas import tpu as pltpu

EMB_PAD = 128  # padded hidden width: exactly one full lane group


# ---------------------------------------------------------------------------
# Kernel
# ---------------------------------------------------------------------------
def critic_kernel(x_ref, y_ref, w12s_ref, w12a_ref, aux_ref, out_ref):
    # Folded (fcs + fca + fcx) layer:  h = relu(x @ W12s + y @ W12a + b12)
    h = jnp.dot(x_ref[...], w12s_ref[...], preferred_element_type=jnp.float32)
    h = h + jnp.dot(y_ref[...], w12a_ref[...], preferred_element_type=jnp.float32)
    h = jnp.maximum(h + aux_ref[0:1, :], 0.0)                  # (tb, EP)

    # Output layer as VPU multiply + XLU lane reduce (no N=1 MXU pass).
    # Lane `emb` of b12 is 1.0 (so h[:, emb] == 1 exactly) and lane `emb` of
    # the out-weight row carries out_b, so the reduce already includes the
    # output bias.  All other padded lanes are exact zeros.
    q = jnp.sum(h * aux_ref[1:2, :], axis=-1, keepdims=True)   # (tb, 1)

    out_ref[...] = q.astype(out_ref.dtype)


# ---------------------------------------------------------------------------
# One-time parameter packing (hoisted out of the per-call path)
# ---------------------------------------------------------------------------
def pack_params(params, emb_pad=EMB_PAD):
    hi = jax.lax.Precision.HIGHEST
    emb = params["fcs_w"].shape[0]
    n_states = params["fcs_w"].shape[1]
    n_actions = params["fca_w"].shape[1]
    EP = emb_pad
    assert emb < EP, "need one spare padded lane for the out-bias fold"

    wxs = params["fcx_w"][:, :emb]      # fcx rows acting on s  (emb, emb)
    wxa = params["fcx_w"][:, emb:]      # fcx rows acting on a  (emb, emb)

    # Fold layer 1 into fcx (no nonlinearity in between => exact algebra).
    w12s_core = jnp.dot(params["fcs_w"].T, wxs.T, precision=hi)   # (n_states, emb)
    w12a_core = jnp.dot(params["fca_w"].T, wxa.T, precision=hi)   # (n_actions, emb)
    b12_core = (jnp.dot(params["fcs_b"], wxs.T, precision=hi)
                + jnp.dot(params["fca_b"], wxa.T, precision=hi)
                + params["fcx_b"])                                # (emb,)

    # Zero-pad to EP lanes so every vreg is full-lane; padded lanes stay exact
    # zeros through bias / relu / reduce.
    w12s = jnp.zeros((n_states, EP), jnp.float32).at[:, :emb].set(w12s_core)
    w12a = jnp.zeros((n_actions, EP), jnp.float32).at[:, :emb].set(w12a_core)

    # aux: row0 = b12 (+ constant-1 lane), row1 = out_w (+ out_b lane).
    # Padded to 8 sublanes for a clean (8, 128)-aligned resident block.
    aux = jnp.zeros((8, EP), jnp.float32)
    aux = aux.at[0, :emb].set(b12_core)
    aux = aux.at[0, emb].set(1.0)                    # relu(1) == 1 carries out_b
    aux = aux.at[1, :emb].set(params["out_w"][0])
    aux = aux.at[1, emb].set(params["out_b"][0])

    return dict(w12s=w12s, w12a=w12a, aux=aux)


# ---------------------------------------------------------------------------
# Batch-tile selection
# ---------------------------------------------------------------------------
def _pick_batch_tile(B, tm):
    """Full block for tiny B; otherwise aim for >=2 grid steps (v7x megacore)
    capped at tm.  Tiled blocks must be a multiple of 8 sublanes."""
    if B <= 8:
        return B                        # single block equal to the full dim
    half = -(-B // 2)                   # cdiv(B, 2)
    return min(tm, ((half + 7) // 8) * 8)


# ---------------------------------------------------------------------------
# Forward wrapper
# ---------------------------------------------------------------------------
@partial(jax.jit, static_argnames=("tm",))
def critic_forward(x, y, packed, *, tm=1024):
    B, n_states = x.shape
    n_actions = y.shape[1]
    EP = packed["w12s"].shape[1]

    x = x.astype(jnp.float32)
    y = y.astype(jnp.float32)

    tb = _pick_batch_tile(B, tm)
    grid = (pl.cdiv(B, tb),)            # ragged last block handled by Pallas

    out = pl.pallas_call(
        critic_kernel,
        out_shape=jax.ShapeDtypeStruct((B, 1), jnp.float32),
        grid_spec=pltpu.PrefetchScalarGridSpec(
            num_scalar_prefetch=0,
            grid=grid,
            in_specs=[
                pl.BlockSpec((tb, n_states), lambda i: (i, 0)),   # batch-tiled x
                pl.BlockSpec((tb, n_actions), lambda i: (i, 0)),  # batch-tiled y
                pl.BlockSpec((n_states, EP), lambda i: (0, 0)),   # resident W12s
                pl.BlockSpec((n_actions, EP), lambda i: (0, 0)),  # resident W12a
                pl.BlockSpec((8, EP), lambda i: (0, 0)),          # resident aux
            ],
            out_specs=pl.BlockSpec((tb, 1), lambda i: (i, 0)),
        ),
        compiler_params=pltpu.CompilerParams(
            dimension_semantics=("parallel",)),
    )(x, y, packed["w12s"], packed["w12a"], packed["aux"])

    return out                                                    # (B, 1)


# ---------------------------------------------------------------------------
# Init + pure-JAX reference (PyTorch semantics)
# ---------------------------------------------------------------------------
def init_params(key, n_states, n_actions, emb_dim):
    """Deterministic init mimicking nn.Linear's default U(-1/sqrt(fan_in), +)."""
    def linear(key, fan_in, fan_out):
        kw, kb = jax.random.split(key)
        bound = 1.0 / jnp.sqrt(float(fan_in))
        w = jax.random.uniform(kw, (fan_out, fan_in), jnp.float32, -bound, bound)
        b = jax.random.uniform(kb, (fan_out,), jnp.float32, -bound, bound)
        return w, b

    k1, k2, k3, k4 = jax.random.split(key, 4)
    fcs_w, fcs_b = linear(k1, n_states, emb_dim)
    fca_w, fca_b = linear(k2, n_actions, emb_dim)
    fcx_w, fcx_b = linear(k3, emb_dim * 2, emb_dim)
    out_w, out_b = linear(k4, emb_dim, 1)
    return dict(fcs_w=fcs_w, fcs_b=fcs_b,
                fca_w=fca_w, fca_b=fca_b,
                fcx_w=fcx_w, fcx_b=fcx_b,
                out_w=out_w, out_b=out_b)


def critic_ref(x, y, p):
    hi = jax.lax.Precision.HIGHEST
    s = jnp.dot(x, p["fcs_w"].T, precision=hi) + p["fcs_b"]
    a = jnp.dot(y, p["fca_w"].T, precision=hi) + p["fca_b"]
    h = jnp.concatenate([s, a], axis=1)
    h = jnp.maximum(jnp.dot(h, p["fcx_w"].T, precision=hi) + p["fcx_b"], 0.0)
    return jnp.dot(h, p["out_w"].T, precision=hi) + p["out_b"]


if __name__ == "__main__":
    n_states, n_actions, emb_dim = 8, 4, 32

    key = jax.random.PRNGKey(0)
    kx, ky, kp, kx2, ky2 = jax.random.split(key, 5)
    params = init_params(kp, n_states, n_actions, emb_dim)
    packed = pack_params(params)          # one-time pre-pack (not per call)

    # Small-batch check (B=2): single full block.
    x = jax.random.normal(kx, (2, n_states), jnp.float32)
    y = jax.random.normal(ky, (2, n_actions), jnp.float32)
    out = jax.block_until_ready(critic_forward(x, y, packed))
    ref = critic_ref(x, y, params)
    assert out.shape == (2, 1)
    assert jnp.allclose(out, ref, atol=1e-4, rtol=1e-4), (out, ref)

    # Larger, ragged-tiled batch check (exercises the multi-block grid path).
    Bl = 2500
    xl = jax.random.normal(kx2, (Bl, n_states), jnp.float32)
    yl = jax.random.normal(ky2, (Bl, n_actions), jnp.float32)
    outl = jax.block_until_ready(critic_forward(xl, yl, packed))
    refl = critic_ref(xl, yl, params)
    assert outl.shape == (Bl, 1)
    assert jnp.allclose(outl, refl, atol=1e-4, rtol=1e-4)

    print("KERNEL_OK")
</pallas_src>

<mosaic_0001>
module attributes {stable_mosaic.version = 11 : i64} {
  func.func @critic_kernel(%arg0: i32, %arg1: memref<2x8xf32, #tpu.memory_space<vmem>>, %arg2: memref<2x4xf32, #tpu.memory_space<vmem>>, %arg3: memref<8x128xf32, #tpu.memory_space<vmem>>, %arg4: memref<4x128xf32, #tpu.memory_space<vmem>>, %arg5: memref<8x128xf32, #tpu.memory_space<vmem>>, %arg6: memref<2x1xf32, #tpu.memory_space<vmem>>) attributes {dimension_semantics = [#tpu.dimension_semantics<parallel>], iteration_bounds = array<i64: 1>, scalar_prefetch = 0 : i64, scratch_operands = 0 : i64, tpu.core_type = #tpu.core_type<tc>, window_params = [{transform_indices = @transform_0, window_bounds = array<i64: 2, 8>}, {transform_indices = @transform_1, window_bounds = array<i64: 2, 4>}, {pipeline_mode = #tpu.pipeline_mode<synchronous>, transform_indices = @transform_2, window_bounds = array<i64: 8, 128>}, {pipeline_mode = #tpu.pipeline_mode<synchronous>, transform_indices = @transform_3, window_bounds = array<i64: 4, 128>}, {pipeline_mode = #tpu.pipeline_mode<synchronous>, transform_indices = @transform_4, window_bounds = array<i64: 8, 128>}, {transform_indices = @transform_5, window_bounds = array<i64: 2, 1>}]} {
    %c0 = arith.constant 0 : index
    %c0_0 = arith.constant 0 : index
    %0 = vector.load %arg1[%c0, %c0_0] : memref<2x8xf32, #tpu.memory_space<vmem>>, vector<2x8xf32>
    %c0_1 = arith.constant 0 : index
    %c0_2 = arith.constant 0 : index
    %1 = vector.load %arg3[%c0_1, %c0_2] : memref<8x128xf32, #tpu.memory_space<vmem>>, vector<8x128xf32>
    %cst = arith.constant dense<0.000000e+00> : vector<2x128xf32>
    %2 = tpu.matmul %0, %1, %cst {dimension_numbers = #tpu.dot_dimension_numbers<[1], [0], [0], [1], [0, 0, 1, 1], [], []>} : vector<2x8xf32>, vector<8x128xf32>, vector<2x128xf32> -> vector<2x128xf32>
    %c0_3 = arith.constant 0 : index
    %c0_4 = arith.constant 0 : index
    %3 = vector.load %arg2[%c0_3, %c0_4] : memref<2x4xf32, #tpu.memory_space<vmem>>, vector<2x4xf32>
    %c0_5 = arith.constant 0 : index
    %c0_6 = arith.constant 0 : index
    %4 = vector.load %arg4[%c0_5, %c0_6] : memref<4x128xf32, #tpu.memory_space<vmem>>, vector<4x128xf32>
    %cst_7 = arith.constant dense<0.000000e+00> : vector<2x128xf32>
    %5 = tpu.matmul %3, %4, %cst_7 {dimension_numbers = #tpu.dot_dimension_numbers<[1], [0], [0], [1], [0, 0, 1, 1], [], []>} : vector<2x4xf32>, vector<4x128xf32>, vector<2x128xf32> -> vector<2x128xf32>
    %6 = arith.addf %2, %5 : vector<2x128xf32>
    %c0_8 = arith.constant 0 : index
    %c0_9 = arith.constant 0 : index
    %7 = vector.load %arg5[%c0_8, %c0_9] : memref<8x128xf32, #tpu.memory_space<vmem>>, vector<1x128xf32>
    %8 = vector.broadcast %7 : vector<1x128xf32> to vector<2x128xf32>
    %9 = arith.addf %6, %8 : vector<2x128xf32>
    %cst_10 = arith.constant 0.000000e+00 : f32
    %10 = vector.broadcast %cst_10 : f32 to vector<2x128xf32>
    %11 = arith.maximumf %9, %10 : vector<2x128xf32>
    %c1 = arith.constant 1 : index
    %c0_11 = arith.constant 0 : index
    %12 = vector.load %arg5[%c1, %c0_11] : memref<8x128xf32, #tpu.memory_space<vmem>>, vector<1x128xf32>
    %13 = vector.broadcast %12 : vector<1x128xf32> to vector<2x128xf32>
    %14 = arith.mulf %11, %13 : vector<2x128xf32>
    %cst_12 = arith.constant dense<0.000000e+00> : vector<2xf32>
    %15 = vector.multi_reduction <add>, %14, %cst_12 [1] : vector<2x128xf32> to vector<2xf32>
    %16 = vector.shape_cast %15 : vector<2xf32> to vector<2x1xf32>
    %c0_13 = arith.constant 0 : index
    %c0_14 = arith.constant 0 : index
    %17 = vector.load %arg6[%c0_13, %c0_14] : memref<2x1xf32, #tpu.memory_space<vmem>>, vector<2x1xf32>
    tpu.vector_store %arg6[%c0_13, %c0_14], %16 {strides = array<i32>} : memref<2x1xf32, #tpu.memory_space<vmem>>, vector<2x1xf32>,
    return
  }
  func.func @transform_0(%arg0: i32) -> (i32, i32) {
    %c0_i32 = arith.constant 0 : i32
    %c0_i32_0 = arith.constant 0 : i32
    return %arg0, %c0_i32 : i32, i32
  }
  func.func @transform_1(%arg0: i32) -> (i32, i32) {
    %c0_i32 = arith.constant 0 : i32
    %c0_i32_0 = arith.constant 0 : i32
    return %arg0, %c0_i32 : i32, i32
  }
  func.func @transform_2(%arg0: i32) -> (i32, i32) {
    %c0_i32 = arith.constant 0 : i32
    %c0_i32_0 = arith.constant 0 : i32
    %c0_i32_1 = arith.constant 0 : i32
    return %c0_i32, %c0_i32_0 : i32, i32
  }
  func.func @transform_3(%arg0: i32) -> (i32, i32) {
    %c0_i32 = arith.constant 0 : i32
    %c0_i32_0 = arith.constant 0 : i32
    %c0_i32_1 = arith.constant 0 : i32
    return %c0_i32, %c0_i32_0 : i32, i32
  }
  func.func @transform_4(%arg0: i32) -> (i32, i32) {
    %c0_i32 = arith.constant 0 : i32
    %c0_i32_0 = arith.constant 0 : i32
    %c0_i32_1 = arith.constant 0 : i32
    return %c0_i32, %c0_i32_0 : i32, i32
  }
  func.func @transform_5(%arg0: i32) -> (i32, i32) {
    %c0_i32 = arith.constant 0 : i32
    %c0_i32_0 = arith.constant 0 : i32
    return %arg0, %c0_i32 : i32, i32
  }
}

</mosaic_0001>

<bundles_post_ra>
// kernel: critic_forward.1
= control target key start
LH: loop header
LB: loop body
LE: loop exit
PB: predicated region body
PF: predicated region fallthrough
CT: control target
= control target key end

     0   :  { %10 = vsyncpa [#allocation3], 0  ;;  %s366_s0 = inlined_call_operand.hbm [shape: f32[2,8], index: 0, kind: input, shape index: {}]   ;;  %s367_s1 = inlined_call_operand.vmem [shape: f32[2,4], index: 1, kind: input, shape index: {}]   ;;  %s368_s2 = inlined_call_operand.vmem [shape: f32[8,128], index: 2, kind: input, shape index: {}]   ;;  %s369_s3 = inlined_call_operand.vmem [shape: f32[4,128], index: 3, kind: input, shape index: {}]   ;;  %s370_s4 = inlined_call_operand.hbm [shape: f32[8,128], index: 4, kind: input, shape index: {}]   ;;  %s371_s5 = inlined_call_operand.vmem [shape: f32[2,1], index: 5, kind: output, shape index: {}]  }
   0x1   :  { %11 = vsyncpa [#allocation5], 0  ;;  %s296_s18 = smov [#allocation2]   ;;  %s297_s20 = smov [#allocation4]  }
   0x2   :  { %s18_s19 = sshll.u32 %s296_s18, 4  ;;  %s34_s21 = sshll.u32 %s297_s20, 4  ;;  %s19_s19 = int_to_ptr.vmem [resolvable:$true] %s18_s19  ;;  %s35_s21 = int_to_ptr.vmem [resolvable:$true] %s34_s21 }
   0x3   :  { %s248_s24 = scalar_lea.hbm %s366_s0, 32 }
   0x4   :  { %p249_p0 = scmp.ne.s32.totalorder %s366_s0, %s248_s24  ;;  %p252_p1 = scmp.lt.u32.totalorder %s248_s24, %s366_s0 }
   0x6   :  { %p254_p2 = pnand %p252_p1, %p249_p0 }
   0x8   :  { %257 = shalt.err (!%p254_p2)
}
   0x9   :  { %s258_s29 = scalar_lea.vmem %s19_s19, 32  ;;  %p263_p4 = scmp.lt.s32.totalorder %s19_s19, %s19_s19 }
   0xa   :  { %p259_p3 = scmp.ne.s32.totalorder %s19_s19, %s258_s29  ;;  %p264_p5 = scmp.lt.s32.totalorder %s258_s29, %s258_s29 }
   0xc   :  { %p265_p6 = por %p264_p5, %p263_p4 }
   0xe   :  { %p266_p7 = pnand %p265_p6, %p259_p3 }
  0x10   :  { %269 = shalt.err (!%p266_p7)
}
  0x11   :  { %21 = dma.hbm_to_vmem [thread:$0]  %s366_s0, 32, %s19_s19, [#allocation3]  }
  0x12   :  { %s270_s9 = scalar_lea.hbm %s370_s4, 128 }
  0x13   :  { %p271_p8 = scmp.ne.s32.totalorder %s370_s4, %s270_s9  ;;  %p274_p9 = scmp.lt.u32.totalorder %s270_s9, %s370_s4 }
  0x15   :  { %p276_p10 = pnand %p274_p9, %p271_p8 }
  0x17   :  { %279 = shalt.err (!%p276_p10)
}
  0x18   :  { %s280_s14 = scalar_lea.vmem %s35_s21, 128  ;;  %p285_p12 = scmp.lt.s32.totalorder %s35_s21, %s35_s21 }
  0x19   :  { %p281_p11 = scmp.ne.s32.totalorder %s35_s21, %s280_s14  ;;  %p286_p13 = scmp.lt.s32.totalorder %s280_s14, %s280_s14 }
  0x1b   :  { %p287_p0 = por %p286_p13, %p285_p12 }
  0x1d   :  { %p288_p1 = pnand %p287_p0, %p281_p11 }
  0x1f   :  { %291 = shalt.err (!%p288_p1)
}
  0x20   :  { %37 = dma.hbm_to_vmem [thread:$0]  %s370_s4, 128, %s35_s21, [#allocation5]  }
  0x21   :  { %292 = dma.done.wait [#allocation3], 32  }
  0x22   :  { %293 = vsyncadd [#allocation3], 4294967264 }
  0x23   :  { %294 = dma.done.wait [#allocation5], 128  }
  0x24   :  { %295 = vsyncadd [#allocation5], 4294967168  ;;  %v298_v0 = vmov 0.0   ;;  %vm299_vm0 = vmmov 0   ;;  %vm52_vm1 = vcmask 1043456   ;;  %vm48_vm2 = vcmask 31744  }
  0x25   :  { %234 = vmatprep.subr.mxu0 %v298_v0  ;;  %239 = vmatprep.subr.mxu1 %v298_v0  ;;  %vm126_vm3 = vcmask 64512   ;;  %v47_v1 = vld [vmem:[%s369_s3] sm:$0xf]  ;;  %v44_v4 = vld [vmem:[#allocation2] sm:$0x3]  ;;  %vm213_vm4 = vcmask 1041408  }
  0x26   :  { %236 = vmatprep.mubr.msk.f32.mxu0 %vm299_vm0, %v298_v0  ;;  %241 = vmatprep.mubr.msk.f32.mxu1 %vm299_vm0, %v298_v0  ;;  %v45_v2 = vld [vmem:[%s368_s2] sm:$0xff]  ;;  %v228_v7 = vld [vmem:[#allocation4] ss:$0 sm:$0xff]  ;;  %v229_v12 = vld [vmem:[#allocation4 + $0x1] ss:$0 sm:$0xff]  ;;  %vm217_vm5 = vcmask 1024  }
  0x27   :  { %v46_v3 = vld [vmem:[%s367_s1] sm:$0x3]  ;;  %235 = vmatpush3.msk.msra.mxu0 %vm52_vm1, %v47_v1  ;;  %240 = vmatpush3.msra.mxu1 %v45_v2 }
  0x28   :  { %237 = vmatmul.mubr.msk.f32.vlgmr.msra.gmra.mrb[0].mxu0 %vm48_vm2, %v46_v3  ;;  %242 = vmatmul.mubr.msk.f32.vlgmr.msra.gmra.mrb[0].mxu1 %vm126_vm3, %v44_v4 }
  0xfb   :  { %v122_v5 = vpop.f32.mrb[0].mxu0  ;;  %v196_v6 = vpop.f32.mrb[0].mxu1 }
  0xfc   :  { %v197_v8 = vadd.f32 %v196_v6, %v122_v5  ;;  %v238_v9 = vpop.f32.mrb[1].mxu0  ;;  %v243_v10 = vpop.f32.mrb[1].mxu1 }
  0xfe   :  { %v205_v11 = vadd.f32 %v228_v7, %v197_v8 }
 0x100   :  { %v206_v13 = vmax.f32 %v205_v11, 0.0 }
 0x102   :  { %v212_v14 = vmul.f32 %v229_v12, %v206_v13 }
 0x104   :  { %v214_v15 = vsel %vm213_vm4, %v212_v14, 0.0 }
 0x105   :  { %215 = vadd.xlane.f32.xlu0 %v214_v15 }
 0x192   :  { %v216_v16 = vpop.xlane.xlu0 %215 }
 0x193   :  { %218 = vst.msk [vmem:[%s371_s5] sm:$0x3] %vm217_vm5, %v216_v16 }
 0x194   :  { %223 = vsyncpa [#allocation3], 1 }
 0x195   :  { %224 = vsyncpa [#allocation5], 1 }

</bundles_post_ra>
